<compile_context>
chip_gen: v6e
topology: v6e:2x2x1
jax: 0.10.0
libtpu: 0.0.40
codegen_flags: <defaults>
</compile_context>

<pallas_src>
import jax
import jax.numpy as jnp
from jax.experimental import pallas as pl
from jax.experimental.pallas import tpu as pltpu

LANE = 128


def mlp_kernel(x_ref, w1_ref, b1_ref, w2_ref, b2_ref, w3_ref, b3_ref, o_ref):
    # In-kernel bf16 cast of the streamed x tile (free in this DMA-bound regime).
    x = x_ref[...].astype(jnp.bfloat16)
    # fc1 + ReLU  (bf16 operands, f32 MXU accumulation)
    h1 = jnp.dot(x, w1_ref[...], preferred_element_type=jnp.float32)
    h1 = jnp.maximum(h1 + b1_ref[...], 0.0).astype(jnp.bfloat16)
    # fc2 + ReLU
    h2 = jnp.dot(h1, w2_ref[...], preferred_element_type=jnp.float32)
    h2 = jnp.maximum(h2 + b2_ref[...], 0.0).astype(jnp.bfloat16)
    # fc3 (output lane-padded to 128 for an unmasked vst)
    out = jnp.dot(h2, w3_ref[...], preferred_element_type=jnp.float32)
    o_ref[...] = (out + b3_ref[...]).astype(o_ref.dtype)


def _round_up(n, m):
    return ((n + m - 1) // m) * m


def simple_mlp_forward(x, w1, b1, w2, b2, w3, b3, *, tile_b=1024,
                       out_dtype=jnp.float32):
    """Forward pass equivalent to PyTorch SimpleMLP.forward (weights stored (in, out)).

    x: (B, ...) flattened to (B, 784) like PyTorch x.view(B, -1). No wrapper-side
    pad/cast passes over x. Pass out_dtype=jnp.bfloat16 to halve output writeback
    if the consumer accepts bf16 logits.
    """
    B = x.shape[0]
    x = x.reshape(B, -1)          # == PyTorch x.view(B, -1); no data movement
    K = x.shape[1]                # 784
    H1 = w1.shape[1]              # 128
    H2 = w2.shape[1]              # 64
    N = w3.shape[1]               # 10

    # Lane-pad only fc3's tiny weight/bias (10 -> 128) for an unmasked output store.
    N_pad = _round_up(N, LANE)
    if N_pad != N:
        w3 = jnp.pad(w3, ((0, 0), (0, N_pad - N)))
        b3 = jnp.pad(b3, ((0, N_pad - N),))

    # Batch tiling: multiple of 8 sublanes; keep >= 2 grid steps so the "parallel"
    # batch axis can shard across v7x's 2 TensorCores even at modest batch sizes.
    tile_b = max(8, (tile_b // 8) * 8)
    if B > 8:
        tile_b = min(tile_b, _round_up(pl.cdiv(B, 2), 8))
    TILE_B = min(tile_b, _round_up(B, 8))
    nb = pl.cdiv(B, TILE_B)       # ragged last tile: OOB reads unspecified, writes dropped

    # Small, one-time casts of the resident weights; biases stay f32 as (1, N) rows.
    w1_bf = w1.astype(jnp.bfloat16)
    w2_bf = w2.astype(jnp.bfloat16)
    w3_bf = w3.astype(jnp.bfloat16)
    b1 = b1.reshape(1, H1).astype(jnp.float32)
    b2 = b2.reshape(1, H2).astype(jnp.float32)
    b3 = b3.reshape(1, N_pad).astype(jnp.float32)

    def resident(shape):  # weights/biases: same block every grid step -> stay in VMEM
        return pl.BlockSpec(shape, lambda i: tuple(0 for _ in shape))

    out_pad = pl.pallas_call(
        mlp_kernel,
        grid=(nb,),
        out_shape=jax.ShapeDtypeStruct((B, N_pad), out_dtype),
        in_specs=[
            pl.BlockSpec((TILE_B, K), lambda i: (i, 0)),  # x tile: streamed, K = full 784
            resident((K, H1)),
            resident((1, H1)),
            resident((H1, H2)),
            resident((1, H2)),
            resident((H2, N_pad)),
            resident((1, N_pad)),
        ],
        out_specs=pl.BlockSpec((TILE_B, N_pad), lambda i: (i, 0)),
        compiler_params=pltpu.CompilerParams(
            dimension_semantics=("parallel",),   # batch tiles shard across TCs on v7x
            vmem_limit_bytes=32 << 20,           # headroom for 1-2K row tiles
        ),
    )(x, w1_bf, b1, w2_bf, b2, w3_bf, b3)

    # Consumers that can read the padded (B, 128) slab should do so and skip this slice.
    return out_pad[:, :N]


def init_params(key):
    # Deterministic init mimicking nn.Linear's uniform(-1/sqrt(fan_in), 1/sqrt(fan_in)).
    def linear(key, fan_in, fan_out):
        kw, kb = jax.random.split(key)
        bound = 1.0 / jnp.sqrt(fan_in)
        w = jax.random.uniform(kw, (fan_in, fan_out), jnp.float32, -bound, bound)
        b = jax.random.uniform(kb, (fan_out,), jnp.float32, -bound, bound)
        return w, b

    k1, k2, k3 = jax.random.split(key, 3)
    w1, b1 = linear(k1, 28 * 28, 128)
    w2, b2 = linear(k2, 128, 64)
    w3, b3 = linear(k3, 64, 10)
    return w1, b1, w2, b2, w3, b3


if __name__ == "__main__":
    key = jax.random.PRNGKey(0)
    kx, kp = jax.random.split(key)

    B = 40
    # MNIST-like images (B, 1, 28, 28); the wrapper flattens like PyTorch x.view(B, -1).
    x_img = jax.random.normal(kx, (B, 1, 28, 28), jnp.float32)
    w1, b1, w2, b2, w3, b3 = init_params(kp)

    # Default tile_b auto-caps to keep >= 2 grid steps at this tiny demo batch,
    # exercising both the batch grid and the ragged-last-tile path.
    out = simple_mlp_forward(x_img, w1, b1, w2, b2, w3, b3)
    out = jax.block_until_ready(out)
    assert out.shape == (B, 10)
    assert bool(jnp.all(jnp.isfinite(out)))

    # Reference with the same bf16-operand / f32-accumulate numerics (tight check).
    x = x_img.reshape(B, -1)

    def ref_dot(a, w):
        return jnp.dot(a.astype(jnp.bfloat16), w.astype(jnp.bfloat16),
                       preferred_element_type=jnp.float32)

    r = jnp.maximum(ref_dot(x, w1) + b1, 0.0)
    r = jnp.maximum(ref_dot(r, w2) + b2, 0.0)
    r = ref_dot(r, w3) + b3
    assert jnp.allclose(out, r, atol=1e-3, rtol=1e-3)

    # Sanity vs full-f32 reference (loose tolerance due to bf16 matmul operands).
    rf = jnp.maximum(x @ w1 + b1, 0.0)
    rf = jnp.maximum(rf @ w2 + b2, 0.0)
    rf = rf @ w3 + b3
    assert jnp.allclose(out, rf, atol=5e-2, rtol=5e-2)

    print("KERNEL_OK")
</pallas_src>

<mosaic_0001>
module attributes {stable_mosaic.version = 11 : i64} {
  func.func @mlp_kernel(%arg0: i32, %arg1: memref<24x784xf32, #tpu.memory_space<vmem>>, %arg2: memref<784x128xbf16, #tpu.memory_space<vmem>>, %arg3: memref<1x128xf32, #tpu.memory_space<vmem>>, %arg4: memref<128x64xbf16, #tpu.memory_space<vmem>>, %arg5: memref<1x64xf32, #tpu.memory_space<vmem>>, %arg6: memref<64x128xbf16, #tpu.memory_space<vmem>>, %arg7: memref<1x128xf32, #tpu.memory_space<vmem>>, %arg8: memref<24x128xf32, #tpu.memory_space<vmem>>) attributes {dimension_semantics = [#tpu.dimension_semantics<parallel>], iteration_bounds = array<i64: 2>, scalar_prefetch = 0 : i64, scratch_operands = 0 : i64, tpu.core_type = #tpu.core_type<tc>, window_params = [{transform_indices = @transform_0, window_bounds = array<i64: 24, 784>}, {pipeline_mode = #tpu.pipeline_mode<synchronous>, transform_indices = @transform_1, window_bounds = array<i64: 784, 128>}, {pipeline_mode = #tpu.pipeline_mode<synchronous>, transform_indices = @transform_2, window_bounds = array<i64: 1, 128>}, {pipeline_mode = #tpu.pipeline_mode<synchronous>, transform_indices = @transform_3, window_bounds = array<i64: 128, 64>}, {pipeline_mode = #tpu.pipeline_mode<synchronous>, transform_indices = @transform_4, window_bounds = array<i64: 1, 64>}, {pipeline_mode = #tpu.pipeline_mode<synchronous>, transform_indices = @transform_5, window_bounds = array<i64: 64, 128>}, {pipeline_mode = #tpu.pipeline_mode<synchronous>, transform_indices = @transform_6, window_bounds = array<i64: 1, 128>}, {transform_indices = @transform_7, window_bounds = array<i64: 24, 128>}]} {
    %c0 = arith.constant 0 : index
    %c0_0 = arith.constant 0 : index
    %0 = vector.load %arg1[%c0, %c0_0] : memref<24x784xf32, #tpu.memory_space<vmem>>, vector<24x784xf32>
    %1 = arith.truncf %0 : vector<24x784xf32> to vector<24x784xbf16>
    %c0_1 = arith.constant 0 : index
    %c0_2 = arith.constant 0 : index
    %2 = vector.load %arg2[%c0_1, %c0_2] : memref<784x128xbf16, #tpu.memory_space<vmem>>, vector<784x128xbf16>
    %cst = arith.constant dense<0.000000e+00> : vector<24x128xf32>
    %3 = tpu.matmul %1, %2, %cst {dimension_numbers = #tpu.dot_dimension_numbers<[1], [0], [0], [1], [0, 0, 1, 1], [], []>} : vector<24x784xbf16>, vector<784x128xbf16>, vector<24x128xf32> -> vector<24x128xf32>
    %c0_3 = arith.constant 0 : index
    %c0_4 = arith.constant 0 : index
    %4 = vector.load %arg3[%c0_3, %c0_4] : memref<1x128xf32, #tpu.memory_space<vmem>>, vector<1x128xf32>
    %5 = vector.broadcast %4 : vector<1x128xf32> to vector<24x128xf32>
    %6 = arith.addf %3, %5 : vector<24x128xf32>
    %cst_5 = arith.constant 0.000000e+00 : f32
    %7 = vector.broadcast %cst_5 : f32 to vector<24x128xf32>
    %8 = arith.maximumf %6, %7 : vector<24x128xf32>
    %9 = arith.truncf %8 : vector<24x128xf32> to vector<24x128xbf16>
    %c0_6 = arith.constant 0 : index
    %c0_7 = arith.constant 0 : index
    %10 = vector.load %arg4[%c0_6, %c0_7] : memref<128x64xbf16, #tpu.memory_space<vmem>>, vector<128x64xbf16>
    %cst_8 = arith.constant dense<0.000000e+00> : vector<24x64xf32>
    %11 = tpu.matmul %9, %10, %cst_8 {dimension_numbers = #tpu.dot_dimension_numbers<[1], [0], [0], [1], [0, 0, 1, 1], [], []>} : vector<24x128xbf16>, vector<128x64xbf16>, vector<24x64xf32> -> vector<24x64xf32>
    %c0_9 = arith.constant 0 : index
    %c0_10 = arith.constant 0 : index
    %12 = vector.load %arg5[%c0_9, %c0_10] : memref<1x64xf32, #tpu.memory_space<vmem>>, vector<1x64xf32>
    %13 = vector.broadcast %12 : vector<1x64xf32> to vector<24x64xf32>
    %14 = arith.addf %11, %13 : vector<24x64xf32>
    %cst_11 = arith.constant 0.000000e+00 : f32
    %15 = vector.broadcast %cst_11 : f32 to vector<24x64xf32>
    %16 = arith.maximumf %14, %15 : vector<24x64xf32>
    %17 = arith.truncf %16 : vector<24x64xf32> to vector<24x64xbf16>
    %c0_12 = arith.constant 0 : index
    %c0_13 = arith.constant 0 : index
    %18 = vector.load %arg6[%c0_12, %c0_13] : memref<64x128xbf16, #tpu.memory_space<vmem>>, vector<64x128xbf16>
    %cst_14 = arith.constant dense<0.000000e+00> : vector<24x128xf32>
    %19 = tpu.matmul %17, %18, %cst_14 {dimension_numbers = #tpu.dot_dimension_numbers<[1], [0], [0], [1], [0, 0, 1, 1], [], []>} : vector<24x64xbf16>, vector<64x128xbf16>, vector<24x128xf32> -> vector<24x128xf32>
    %c0_15 = arith.constant 0 : index
    %c0_16 = arith.constant 0 : index
    %20 = vector.load %arg7[%c0_15, %c0_16] : memref<1x128xf32, #tpu.memory_space<vmem>>, vector<1x128xf32>
    %21 = vector.broadcast %20 : vector<1x128xf32> to vector<24x128xf32>
    %22 = arith.addf %19, %21 : vector<24x128xf32>
    %c0_17 = arith.constant 0 : index
    %c0_18 = arith.constant 0 : index
    %23 = vector.load %arg8[%c0_17, %c0_18] : memref<24x128xf32, #tpu.memory_space<vmem>>, vector<24x128xf32>
    tpu.vector_store %arg8[%c0_17, %c0_18], %22 {strides = array<i32>} : memref<24x128xf32, #tpu.memory_space<vmem>>, vector<24x128xf32>,
    return
  }
  func.func @transform_0(%arg0: i32) -> (i32, i32) {
    %c0_i32 = arith.constant 0 : i32
    %c0_i32_0 = arith.constant 0 : i32
    return %arg0, %c0_i32 : i32, i32
  }
  func.func @transform_1(%arg0: i32) -> (i32, i32) {
    %c0_i32 = arith.constant 0 : i32
    %c0_i32_0 = arith.constant 0 : i32
    %c0_i32_1 = arith.constant 0 : i32
    return %c0_i32, %c0_i32_0 : i32, i32
  }
  func.func @transform_2(%arg0: i32) -> (i32, i32) {
    %c0_i32 = arith.constant 0 : i32
    %c0_i32_0 = arith.constant 0 : i32
    %c0_i32_1 = arith.constant 0 : i32
    return %c0_i32, %c0_i32_0 : i32, i32
  }
  func.func @transform_3(%arg0: i32) -> (i32, i32) {
    %c0_i32 = arith.constant 0 : i32
    %c0_i32_0 = arith.constant 0 : i32
    %c0_i32_1 = arith.constant 0 : i32
    return %c0_i32, %c0_i32_0 : i32, i32
  }
  func.func @transform_4(%arg0: i32) -> (i32, i32) {
    %c0_i32 = arith.constant 0 : i32
    %c0_i32_0 = arith.constant 0 : i32
    %c0_i32_1 = arith.constant 0 : i32
    return %c0_i32, %c0_i32_0 : i32, i32
  }
  func.func @transform_5(%arg0: i32) -> (i32, i32) {
    %c0_i32 = arith.constant 0 : i32
    %c0_i32_0 = arith.constant 0 : i32
    %c0_i32_1 = arith.constant 0 : i32
    return %c0_i32, %c0_i32_0 : i32, i32
  }
  func.func @transform_6(%arg0: i32) -> (i32, i32) {
    %c0_i32 = arith.constant 0 : i32
    %c0_i32_0 = arith.constant 0 : i32
    %c0_i32_1 = arith.constant 0 : i32
    return %c0_i32, %c0_i32_0 : i32, i32
  }
  func.func @transform_7(%arg0: i32) -> (i32, i32) {
    %c0_i32 = arith.constant 0 : i32
    %c0_i32_0 = arith.constant 0 : i32
    return %arg0, %c0_i32 : i32, i32
  }
}

</mosaic_0001>

<bundles_post_ra>
// kernel: tpu_custom_call.1
= control target key start
LH: loop header
LB: loop body
LE: loop exit
PB: predicated region body
PF: predicated region fallthrough
CT: control target
= control target key end

     0   :  { %s2077_s0 = inlined_call_operand.hbm [shape: f32[40,784], index: 0, kind: input, shape index: {}]   ;;  %s2078_s1 = inlined_call_operand.hbm [shape: bf16[784,128], index: 1, kind: input, shape index: {}]   ;;  %s2079_s2 = inlined_call_operand.vmem [shape: f32[1,128], index: 2, kind: input, shape index: {}]   ;;  %s2080_s3 = inlined_call_operand.vmem [shape: bf16[128,64], index: 3, kind: input, shape index: {}]   ;;  %s2081_s4 = inlined_call_operand.vmem [shape: f32[1,64], index: 4, kind: input, shape index: {}]   ;;  %s2082_s5 = inlined_call_operand.vmem [shape: bf16[64,128], index: 5, kind: input, shape index: {}]   ;;  %s2083_s6 = inlined_call_operand.vmem [shape: f32[1,128], index: 6, kind: input, shape index: {}]   ;;  %s2084_s7 = inlined_call_operand.hbm [shape: f32[40,128], index: 7, kind: output, shape index: {}]  }
   0x1   :  { %2087 = sst [smem:[#allocation11_spill]] %s2078_s1 }
   0x2   :  { %12 = vsyncpa [#allocation3], 0 }
   0x3   :  { %14 = vsyncpa [#allocation3 + $0x1], 0 }
   0x4   :  { %15 = vsyncpa [#allocation6], 0 }
   0x5   :  { %16 = vsyncpa [#allocation4], 0 }
   0x6   :  { %18 = vsyncpa [#allocation4 + $0x1], 0  ;;  %s1815_s24 = smov 0   ;;  %s1817_s25 = smov 0  }
   0x7   :  { %s1819_s26 = smov 0   ;;  %s1821_s27 = smov 0  }
   0x8 LB: > { %s1836_s28 = sadd.s32 4294967295, %s1764_s27   ;;  %s1294_s29 = sadd.s32 4294967294, %s1764_s27   ;;  %s1764_s27 = sphi %s1821_s27, %s2101_s27   ;;  %s1760_s26 = sphi %s1819_s26, %s2100_s26   ;;  %s1756_s25 = sphi %s1817_s25, %s2099_s25   ;;  %s1752_s24 = sphi %s1815_s24, %s2098_s24  }
   0x9   : > { %s1840_s30 = sadd.s32 1, %s1764_s27   ;;  %s31_s8 = sadd.s32 1, %s1760_s26 }
   0xa   : > { %s28_s9 = ssub.s32 %s1764_s27, %s1840_s30  ;;  %p38_p0 = scmp.ne.s32.totalorder %s1760_s26, %s1756_s25 }
   0xb   : > { %p29_p1 = scmp.eq.s32.totalorder %s28_s9, 0  ;;  %p39_p2 = scmp.eq.s32.totalorder %s1764_s27, 0 }
   0xc   : > { %p44_p3 = scmp.ne.s32.totalorder %s1756_s25, %s1752_s24  ;;  %p45_p4 = scmp.eq.s32.totalorder %s1836_s28, 0 }
   0xd   : > { %s1852_s10 = scalar_select %p29_p1, %s1760_s26, %s31_s8  }
   0xe   : > { %p1854_p5 = por %p39_p2, %p38_p0  ;;  %p1860_p6 = por %p45_p4, %p44_p3 }
   0xf   : > { %p194_p7 = scmp.eq.s32.totalorder %s1836_s28, 1  ;;  %p200_p8 = scmp.eq.s32.totalorder %s1294_s29, 1 }
  0x10   : > { %s2089_s12 = scalar_select %p1860_p6, 1, 0 }
  0x11   : > { %p1295_p9 = scmp.ge.s32.totalorder %s1764_s27, 1  ;;  %p207_p10 = scmp.lt.s32.totalorder %s1764_s27, 3 }
  0x12   : > { %p1867_p11 = por %p194_p7, %p38_p0  ;;  %p1871_p12 = por %p200_p8, %p44_p3 }
  0x13   : > { %p1875_p13 = pnand %p1295_p9, %p207_p10  ;;  %s1766_s16 = smov [#allocation5]  }
  0x14   : > { %s2090_s13 = scalar_select %p1867_p11, 1, 0 }
  0x15   : > { %s2091_s14 = scalar_select %p1871_p12, 1, 0 }
  0x16   : > { %p1532_p1 = pneg %p1875_p13  ;;  %s219_s17 = sshll.u32 %s1766_s16, 4  ;;  %s220_s17 = int_to_ptr.vmem [resolvable:$true] %s219_s17 }
  0x17   : > { %s1655_s18 = scalar_lea.vmem %s220_s17, 6272  ;;  %p1663_p8 = scmp.lt.s32.totalorder %s220_s17, %s220_s17 }
  0x18   : > { %p1533_p2 = pnand %p1532_p1, %p45_p4  ;;  %p1656_p7 = scmp.ne.s32.totalorder %s220_s17, %s1655_s18 }
  0x19   : > { %p1664_p6 = scmp.lt.s32.totalorder %s1655_s18, %s1655_s18 }
  0x1a   : > { %p1646_p0 = pneg %p1533_p2 }
  0x1b   : > { %p1665_p12 = por %p1664_p6, %p1663_p8 }
  0x1c   : > { %p1658_p11 = pnand %p1656_p7, %p1646_p0 }
  0x1e   : > { %p1659_p3 = pneg %p1658_p11 }
  0x20   : > { %p1666_p9 = pnand %p1665_p12, %p1659_p3 }
  0x22   : > { %1669 = shalt.err (!%p1666_p9)
}
  0x23   : > { %s1767_s19 = smov 64   ;;  %s1768_s20 = smov 4  }
  0x24   : > { %s2093_s1 = sld [smem:[#allocation11_spill]]  ;;  %p2086_p10 = scmp.ge.s32.totalorder %s1764_s27, 2 }
  0x26   : > { %244 = sbr.rel (%p2086_p10) target bundleno = 78 (0x4e), region = 40 }
  0x2a   : > { %1535 = dma.hbm_to_vmem [thread:$0]  (!%p1533_p2), %s2093_s1, 6272, %s220_s17, [#allocation6], %s1767_s19, %s1767_s19, %s1768_s20  }
  0x2b   : > { %247 = sbr.rel (!%p1854_p5) target bundleno = 78 (0x4e), region = 44  ;;  %s248_s23 = sand.u32 (%p1854_p5), 1, %s1760_s26  }
  0x2c   : > { %s253_s29 = smul.u32 (%p1854_p5), 3, %s1764_s27  ;;  %s1896_s18 = scalar_lea.sflag (%p1854_p5), [#allocation3], %s248_s23 }
  0x2d   : > { %s1522_s8 = smul.u32 (%p1854_p5), 168, %s248_s23 }
  0x2e   : > { %s254_s9 = ssub.s32 (%p1854_p5), 5, %s253_s29 }
  0x2f   : > { %p255_p6 = scmp.lt.s32.totalorder (%p1854_p5), %s254_s9, 3  ;;  %s252_s19 = scalar_lea.vmem (%p1854_p5), [#allocation2], %s1522_s8 }
  0x31   : > { %s2103_s9 = smov (!%p255_p6, %s254_s9), 3 }
  0x32   : > { %s1893_s16 = smul.u32 896, %s2103_s9 }
  0x34   : > { %s260_s17 = ssub.s32 2688, %s1893_s16 }
  0x35   : > { %261 = vsyncadd %s1896_s18, %s260_s17  ;;  %p1300_p5 = scmp.ne.s32.totalorder %s1893_s16, 0  ;;  %s1541_s11 = smul.u32 2688, %s1764_s27 }
  0x36   : > { %s267_s20 = sshll.u32 %s252_s19, 4  ;;  %s1674_s17 = scalar_lea.hbm %s2077_s0, 4480  ;;  %s1906_s20 = int_to_ptr.vmem [resolvable:$true] %s267_s20 }
  0x37   : > { %s1904_s29 = scalar_lea.hbm %s2077_s0, %s1541_s11 }
  0x38   : > { %s1670_s23 = scalar_lea.hbm %s1904_s29, %s1893_s16  ;;  %p1675_p2 = scmp.lt.s32.totalorder %s1904_s29, %s2077_s0 }
  0x39   : > { %p1671_p11 = scmp.ne.s32.totalorder %s1904_s29, %s1670_s23  ;;  %p1676_p0 = scmp.lt.s32.totalorder %s1674_s17, %s1670_s23 }
  0x3b   : > { %p1672_p12 = pnand %p1671_p11, %p1300_p5  ;;  %p1677_p7 = por %p1676_p0, %p1675_p2 }
  0x3d   : > { %p1673_p1 = pneg %p1672_p12 }
  0x3f   : > { %p1678_p3 = pnand %p1677_p7, %p1673_p1 }
  0x41   : > { %1681 = shalt.err (!%p1678_p3)
}
  0x42   : > { %s1682_s11 = scalar_lea.vmem %s1906_s20, %s1893_s16  ;;  %s1769_s21 = smov [#allocation2]  }
  0x43   : > { %p1683_p8 = scmp.ne.s32.totalorder %s1906_s20, %s1682_s11  ;;  %s1686_s22 = sshll.u32 %s1769_s21, 4  ;;  %s1687_s22 = int_to_ptr.vmem [resolvable:$false] %s1686_s22 }
  0x44   : > { %s1688_s8 = scalar_lea.vmem %s1687_s22, 5376  ;;  %p1689_p11 = scmp.lt.s32.totalorder %s1906_s20, %s1687_s22 }
  0x45   : > { %p1684_p9 = pnand %p1683_p8, %p1300_p5  ;;  %p1690_p12 = scmp.lt.s32.totalorder %s1688_s8, %s1682_s11 }
  0x47   : > { %p1685_p6 = pneg %p1684_p9  ;;  %p1691_p10 = por %p1690_p12, %p1689_p11 }
  0x49   : > { %p1692_p2 = pnand %p1691_p10, %p1685_p6 }
  0x4b   : > { %1695 = shalt.err (!%p1692_p2)
}
  0x4c   : > { %s1770_s1 = smov 896   ;;  %s1771_s23 = smov 56  }
  0x4d   : > { %273 = dma.hbm_to_vmem [thread:$0]  (%p1300_p5), %s1904_s29, %s1893_s16, %s1906_s20, %s1896_s18, %s1770_s1, %s1770_s1, %s1771_s23  }
  0x4e PF: > { %279 = sbr.rel (%p1875_p13) target bundleno = 799 (0x31f), region = 48  ;;  %s1935_s9 = sand.u32 (!%p1875_p13), 1, %s1756_s25  }
  0x4f   : > { %s1524_s17 = smul.u32 (!%p1875_p13), 168, %s1935_s9  ;;  %s282_s19 = scalar_lea.sflag (!%p1875_p13), [#allocation3], %s1935_s9 }
  0x50   : > { %p2094_p10 = scmp.ne.s32.totalorder (!%p1875_p13), %s2089_s12, 0 }
  0x51   : > { %s1939_s11 = scalar_lea.vmem (!%p1875_p13), [#allocation2], %s1524_s17 }
  0x53   : > { %1739 = dma.done.wait (%p2094_p10), %s282_s19, 2688  }
  0x54   : > { %1741 = vsyncadd (%p2094_p10), %s282_s19, 4294964608 }
  0x55   : > { %1743 = dma.done.wait (%p45_p4), [#allocation6], 6272  }
  0x56   : > { %1745 = vsyncadd (%p45_p4), [#allocation6], 4294961024  ;;  %v1583_v0 = vld [vmem:[#allocation5 + $0x78] sm:$0xff]   ;;  %v1587_v4 = vld [vmem:[#allocation5 + $0x70] sm:$0xff]   ;;  %vm766_vm0 = vcmask 130048   ;;  %vm1133_vm1 = vcmask 523264  }
  0x57   : > { %v1584_v1 = vld [vmem:[#allocation5 + $0x38] sm:$0xff]   ;;  %1381 = vmatprep.subr.bf16.mxu0 %v1583_v0  ;;  %v1588_v5 = vld [vmem:[#allocation5 + $0x30] sm:$0xff]   ;;  %v1591_v8 = vld [vmem:[#allocation5 + $0x68] sm:$0xff]   ;;  %s1525_s12 = smul.u32 24, %s1935_s9  ;;  %s1192_s20 = scalar_lea.sflag [#allocation4], %s1935_s9 }
  0x58   : > { %v1585_v2 = vld [vmem:[#allocation5 + $0xf8] sm:$0xff]   ;;  %1382 = vmatpush3.bf16.msra.mxu0 %v1584_v1  ;;  %v1589_v6 = vld [vmem:[#allocation5 + $0xf0] sm:$0xff]   ;;  %v1592_v9 = vld [vmem:[#allocation5 + $0x28] sm:$0xff]   ;;  %p2095_p4 = scmp.ne.s32.totalorder %s2090_s13, 0 }
  0x59   : > { %v1586_v3 = vld [vmem:[#allocation5 + $0xb8] sm:$0xff]   ;;  %1409 = vmatprep.subr.bf16.mxu1 %v1585_v2  ;;  %1383 = vmatprep.subr.bf16.mxu0 %v1587_v4  ;;  %v1590_v7 = vld [vmem:[#allocation5 + $0xb0] sm:$0xff]   ;;  %v1593_v10 = vld [vmem:[#allocation5 + $0xe8] sm:$0xff]   ;;  %s319_s18 = scalar_lea.vmem [#allocation7], %s1525_s12  ;;  %s1199_s29 = smul.u32 (%p2095_p4), 3, %s1836_s28 }
  0x5a   : > { %1410 = vmatpush3.bf16.msra.mxu1 %v1586_v3  ;;  %v1594_v11 = vld [vmem:[#allocation5 + $0xa8] sm:$0xff]   ;;  %v1595_v12 = vld [vmem:[#allocation5 + $0x60] sm:$0xff]   ;;  %v1599_v16 = vld [vmem:[#allocation5 + $0x58] sm:$0xff]  }
  0x5b   : > { %1411 = vmatprep.subr.bf16.mxu1 %v1589_v6  ;;  %v1596_v13 = vld [vmem:[#allocation5 + $0x20] sm:$0xff]   ;;  %v1600_v17 = vld [vmem:[#allocation5 + $0x18] sm:$0xff]   ;;  %v1603_v20 = vld [vmem:[#allocation5 + $0x50] sm:$0xff]   ;;  %s1200_s21 = ssub.s32 (%p2095_p4), 5, %s1199_s29 }
  0x5c   : > { %1384 = vmatpush3.bf16.msra.mxu0 %v1588_v5  ;;  %v1597_v14 = vld [vmem:[#allocation5 + $0xe0] sm:$0xff]   ;;  %v1601_v18 = vld [vmem:[#allocation5 + $0xd8] sm:$0xff]   ;;  %v1604_v21 = vld [vmem:[#allocation5 + $0x10] sm:$0xff]   ;;  %p1201_p13 = scmp.lt.s32.totalorder (%p2095_p4), %s1200_s21, 3 }
  0x5d   : > { %1385 = vmatprep.subr.bf16.mxu0 %v1591_v8  ;;  %v1598_v15 = vld [vmem:[#allocation5 + $0xa0] sm:$0xff]   ;;  %v1602_v19 = vld [vmem:[#allocation5 + $0x98] sm:$0xff]   ;;  %v1605_v22 = vld [vmem:[#allocation5 + $0xd0] sm:$0xff]  }
  0x5e   : > { %1412 = vmatpush3.bf16.msra.mxu1 %v1590_v7  ;;  %v1606_v23 = vld [vmem:[#allocation5 + $0x90] sm:$0xff]   ;;  %v1607_v24 = vld [vmem:[#allocation5 + $0x48] sm:$0xff]   ;;  %v1611_v28 = vld [vmem:[#allocation5 + $0x40] sm:$0xff]  }
  0x5f   : > { %1413 = vmatprep.subr.bf16.mxu1 %v1593_v10  ;;  %v1608_v25 = vld [vmem:[#allocation5 + $0x8] sm:$0xff]   ;;  %v1612_v29 = vld [vmem:[#allocation5] sm:$0xff]   ;;  %v340_v32 = vld [vmem:[%s1939_s11 + $0x40] sm:$0xff] }
  0x60   : > { %1386 = vmatpush3.bf16.msra.mxu0 %v1592_v9  ;;  %v1609_v26 = vld [vmem:[#allocation5 + $0xc8] sm:$0xff]   ;;  %v1613_v30 = vld [vmem:[#allocation5 + $0xc0] sm:$0xff]   ;;  %v332_v35 = vld [vmem:[%s1939_s11] sm:$0xff] }
  0x61   : > { %1387 = vmatprep.subr.bf16.mxu0 %v1595_v12  ;;  %v1610_v27 = vld [vmem:[#allocation5 + $0x88] sm:$0xff]   ;;  %v333_v31 = vld [vmem:[%s1939_s11 + $0x8] sm:$0xff]  ;;  %v1617_v46 = vld [vmem:[#allocation5 + $0x170] sm:$0xff]  }
  0x62   : > { %1414 = vmatpush3.bf16.msra.mxu1 %v1594_v11  ;;  %v354_v33 = vpack.c.bf16 %v340_v32, %v333_v31  ;;  %v1614_v34 = vld [vmem:[#allocation5 + $0x80] sm:$0xff]   ;;  %v339_v36 = vld [vmem:[%s1939_s11 + $0x38] sm:$0xff]  ;;  %v1615_v38 = vld [vmem:[#allocation5 + $0x178] sm:$0xff]  }
  0x63   : > { %1415 = vmatprep.subr.bf16.mxu1 %v1597_v14  ;;  %v353_v37 = vpack.c.bf16 %v339_v36, %v332_v35  ;;  %v335_v39 = vld [vmem:[%s1939_s11 + $0x18] sm:$0xff]  ;;  %v342_v40 = vld [vmem:[%s1939_s11 + $0x50] sm:$0xff]  ;;  %v1616_v42 = vld [vmem:[#allocation5 + $0x138] sm:$0xff]  }
  0x64   : > { %1388 = vmatpush3.bf16.msra.mxu0 %v1596_v13  ;;  %805 = vmatprep.mubr.bf16.mxu0 %v354_v33  ;;  %v356_v41 = vpack.c.bf16 %v342_v40, %v335_v39  ;;  %v334_v43 = vld [vmem:[%s1939_s11 + $0x10] sm:$0xff]  ;;  %v341_v44 = vld [vmem:[%s1939_s11 + $0x48] sm:$0xff]  ;;  %v1618_v47 = vld [vmem:[#allocation5 + $0x130] sm:$0xff]  }
  0x65   : > { %1389 = vmatprep.subr.bf16.mxu0 %v1599_v16  ;;  %v355_v45 = vpack.c.bf16 %v341_v44, %v334_v43  ;;  %v1619_v48 = vld [vmem:[#allocation5 + $0x168] sm:$0xff]   ;;  %v1621_v50 = vld [vmem:[#allocation5 + $0x160] sm:$0xff]   ;;  %v1623_v55 = vld [vmem:[#allocation5 + $0x158] sm:$0xff]  }
  0x66   : > { %1416 = vmatpush3.bf16.msra.mxu1 %v1598_v15  ;;  %853 = vmatprep.mubr.bf16.mxu1 %v356_v41  ;;  %v1620_v49 = vld [vmem:[#allocation5 + $0x128] sm:$0xff]   ;;  %v1622_v52 = vld [vmem:[#allocation5 + $0x120] sm:$0xff]   ;;  %v348_v59 = vld [vmem:[%s1939_s11 + $0x80] sm:$0xff] }
  0x67   : > { %1417 = vmatprep.subr.bf16.mxu1 %v1601_v18  ;;  %v347_v51 = vld [vmem:[%s1939_s11 + $0x78] sm:$0xff]  ;;  %v346_v54 = vld [vmem:[%s1939_s11 + $0x70] sm:$0xff]  ;;  %v349_v58 = vld [vmem:[%s1939_s11 + $0x88] sm:$0xff]  ;;  %v362_v62 = vpack.c.bf16 %v348_v59, %v348_v59 }
  0x68   : > { %1390 = vmatpush3.bf16.msra.mxu0 %v1600_v17  ;;  %v361_v53 = vpack.c.bf16 %v347_v51, %v347_v51  ;;  %v360_v56 = vpack.c.bf16 %v346_v54, %v346_v54  ;;  %v1627_v57 = vld [vmem:[#allocation5 + $0x180] sm:$0xff]   ;;  %v1624_v60 = vld [vmem:[#allocation5 + $0x118] sm:$0xff]   ;;  %v363_v61 = vpack.c.bf16 %v349_v58, %v349_v58  ;;  %v1625_v63 = vld [vmem:[#allocation5 + $0x150] sm:$0xff]  }
  0x69   : > { %1391 = vmatprep.subr.bf16.mxu0 %v1603_v20  ;;  %v1626_v0 = vld [vmem:[#allocation5 + $0x110] sm:$0xff]   ;;  %v337_v1 = vld [vmem:[%s1939_s11 + $0x28] sm:$0xff]  ;;  %v1628_v3 = vld [vmem:[#allocation5 + $0x148] sm:$0xff]  }
  0x6a   : > { %1418 = vmatpush3.bf16.msra.mxu1 %v1602_v19  ;;  %v344_v2 = vld [vmem:[%s1939_s11 + $0x60] sm:$0xff]  ;;  %v338_v5 = vld [vmem:[%s1939_s11 + $0x30] sm:$0xff]  ;;  %v345_v6 = vld [vmem:[%s1939_s11 + $0x68] sm:$0xff] }
  0x6b   : > { %1419 = vmatprep.subr.bf16.mxu1 %v1605_v22  ;;  %v358_v4 = vpack.c.bf16 %v344_v2, %v337_v1  ;;  %v1629_v7 = vld [vmem:[#allocation5 + $0x108] sm:$0xff]   ;;  %v359_v8 = vpack.c.bf16 %v345_v6, %v338_v5  ;;  %v352_v9 = vld [vmem:[%s1939_s11 + $0xa0] sm:$0xff]  ;;  %v1630_v10 = vld [vmem:[#allocation5 + $0x140] sm:$0xff]  }
  0x6c   : > { %1392 = vmatpush3.bf16.msra.mxu0 %v1604_v21  ;;  %v366_v11 = vpack.c.bf16 %v352_v9, %v352_v9  ;;  %v1631_v12 = vld [vmem:[#allocation5 + $0x100] sm:$0xff]   ;;  %v336_v13 = vld [vmem:[%s1939_s11 + $0x20] sm:$0xff]  ;;  %v343_v14 = vld [vmem:[%s1939_s11 + $0x58] sm:$0xff] }
  0x6d   : > { %1393 = vmatprep.subr.bf16.mxu0 %v1607_v24  ;;  %v351_v15 = vld [vmem:[%s1939_s11 + $0x98] sm:$0xff]  ;;  %v357_v16 = vpack.c.bf16 %v343_v14, %v336_v13  ;;  %v350_v18 = vld [vmem:[%s1939_s11 + $0x90] sm:$0xff]  ;;  %v1634_v22 = vld [vmem:[%s2080_s3 + $0x28] sm:$0xff]  }
  0x6e   : > { %1420 = vmatpush3.bf16.msra.mxu1 %v1606_v23  ;;  %v365_v17 = vpack.c.bf16 %v351_v15, %v351_v15  ;;  %v364_v19 = vpack.c.bf16 %v350_v18, %v350_v18  ;;  %v1632_v20 = vld [vmem:[%s2080_s3 + $0x38] sm:$0xff]   ;;  %v1633_v21 = vld [vmem:[%s2080_s3 + $0x30] sm:$0xff]   ;;  %v1635_v23 = vld [vmem:[%s2080_s3 + $0x20] sm:$0xff]  }
  0x6f   : > { %1421 = vmatprep.subr.bf16.mxu1 %v1609_v26  ;;  %v1636_v24 = vld [vmem:[%s2080_s3 + $0x18] sm:$0xff]   ;;  %v1638_v26 = vld [vmem:[%s2080_s3 + $0x8] sm:$0xff]  }
  0x70   : > { %1394 = vmatpush3.bf16.msra.mxu0 %v1608_v25  ;;  %v1637_v25 = vld [vmem:[%s2080_s3 + $0x10] sm:$0xff]  }
  0x71   : > { %1395 = vmatprep.subr.bf16.mxu0 %v1611_v28  ;;  %v1640_v28 = vld [vmem:[%s2082_s5 + $0x18] sm:$0xff]  }
  0x72   : > { %1422 = vmatpush3.bf16.msra.mxu1 %v1610_v27  ;;  %v1639_v27 = vld [vmem:[%s2080_s3] sm:$0xff]  }
  0x73   : > { %1423 = vmatprep.subr.bf16.mxu1 %v1613_v30 }
  0x74   : > { %1396 = vmatpush3.bf16.msra.mxu0 %v1612_v29 }
  0x75   : > { %1437 = vmatprep.subr.bf16.mxu0 %v1615_v38 }
  0x76   : > { %1424 = vmatpush3.bf16.msra.mxu1 %v1614_v34 }
  0x77   : > { %806 = vmatmul.mubr.bf16.vlgmr.msra.gmra.mxu0 %v353_v37  ;;  %1484 = vmatprep.subr.bf16.mxu1 %v1627_v57 }
  0x78   : > { %1438 = vmatpush3.bf16.msra.mxu0 %v1616_v42  ;;  %813 = vmatprep.mubr.bf16.mxu0 %v361_v53 }
  0x79   : > { %854 = vmatmul.mubr.bf16.vlgmr.msra.gmra.mxu1 %v355_v45  ;;  %1439 = vmatprep.subr.bf16.mxu0 %v1617_v46 }
  0x7a   : > { %861 = vmatprep.mubr.bf16.mxu1 %v363_v61  ;;  %1485 = vmatpush3.bf16.msra.mxu1 %v1627_v57 }
  0x7b   : > { %1490 = vmatprep.subr.bf16.mxu1 %v1632_v20 }
  0x7c   : > { %1440 = vmatpush3.bf16.msra.mxu0 %v1618_v47 }
  0x7d   : > { %1441 = vmatprep.subr.bf16.mxu0 %v1619_v48  ;;  %v1305_v48 = vld [vmem:[%s2079_s2] ss:$0 sm:$0xff] }
  0x7f   : > { %814 = vmatmul.mubr.bf16.gmra.mxu0 %v360_v56 }
  0x80   : > { %1442 = vmatpush3.bf16.msra.mxu0 %v1620_v49  ;;  %901 = vmatprep.mubr.bf16.mxu0 %v358_v4 }
  0x81   : > { %1443 = vmatprep.subr.bf16.mxu0 %v1621_v50  ;;  %862 = vmatmul.mubr.bf16.gmra.mxu1 %v362_v62 }
  0x82   : > { %1486 = vmatprep.mubr.msk.bf16.mxu1 %vm766_vm0, %v359_v8 }
  0x84   : > { %1444 = vmatpush3.bf16.msra.mxu0 %v1622_v52 }
  0x85   : > { %1445 = vmatprep.subr.bf16.mxu0 %v1623_v55 }
  0x88   : > { %1446 = vmatpush3.bf16.msra.mxu0 %v1624_v60 }
  0x89   : > { %1447 = vmatprep.subr.bf16.mxu0 %v1625_v63  ;;  %1487 = vmatmul.mubr.msk.bf16.vlgmr.msra.gmra.mxu1 %vm766_vm0, %v366_v11 }
  0x8a   : > { %1491 = vmatpush3.bf16.msra.mxu1 %v1632_v20  ;;  %v1641_v20 = vld [vmem:[%s2082_s5 + $0x10] sm:$0xff]  }
  0x8b   : > { %1492 = vmatprep.subr.bf16.mxu1 %v1633_v21 }
  0x8c   : > { %1448 = vmatpush3.bf16.msra.mxu0 %v1626_v0 }
  0x8d   : > { %1449 = vmatprep.subr.bf16.mxu0 %v1628_v3 }
  0x8e   : > { %1493 = vmatpush3.bf16.msra.mxu1 %v1633_v21  ;;  %v1642_v21 = vld [vmem:[%s2082_s5 + $0x8] sm:$0xff]  }
  0x8f   : > { %1494 = vmatprep.subr.bf16.mxu1 %v1634_v22 }
  0x90   : > { %1450 = vmatpush3.bf16.msra.mxu0 %v1629_v7 }
  0x91   : > { %1451 = vmatprep.subr.bf16.mxu0 %v1630_v10 }
  0x92   : > { %1495 = vmatpush3.bf16.msra.mxu1 %v1634_v22  ;;  %v1643_v22 = vld [vmem:[%s2082_s5] sm:$0xff]  }
  0x93   : > { %1496 = vmatprep.subr.bf16.mxu1 %v1635_v23 }
  0x94   : > { %1452 = vmatpush3.bf16.msra.mxu0 %v1631_v12 }
  0x95   : > { %1510 = vmatprep.subr.bf16.mxu0 %v1640_v28 }
  0x96   : > { %1497 = vmatpush3.bf16.msra.mxu1 %v1635_v23 }
  0x97   : > { %902 = vmatmul.mubr.bf16.vlgmr.msra.gmra.mxu0 %v357_v16  ;;  %1498 = vmatprep.subr.bf16.mxu1 %v1636_v24 }
  0x98   : > { %909 = vmatprep.mubr.bf16.mxu0 %v365_v17  ;;  %1511 = vmatpush3.bf16.msra.mxu0 %v1640_v28 }
  0x99   : > { %1512 = vmatprep.subr.bf16.mxu0 %v1641_v20 }
  0x9a   : > { %1499 = vmatpush3.bf16.msra.mxu1 %v1636_v24  ;;  %v1357_v24 = vld [vmem:[%s2081_s4] ss:$0 sm:$0xff] }
  0x9b   : > { %1500 = vmatprep.subr.bf16.mxu1 %v1637_v25 }
  0x9c   : > { %1513 = vmatpush3.bf16.msra.mxu0 %v1641_v20 }
  0x9d   : > { %1514 = vmatprep.subr.bf16.mxu0 %v1642_v21 }
  0x9e   : > { %1501 = vmatpush3.bf16.msra.mxu1 %v1637_v25 }
  0x9f   : > { %910 = vmatmul.mubr.bf16.gmra.mxu0 %v364_v19  ;;  %1502 = vmatprep.subr.bf16.mxu1 %v1638_v26 }
  0xa0   : > { %1515 = vmatpush3.bf16.msra.mxu0 %v1642_v21 }
  0xa1   : > { %1516 = vmatprep.subr.bf16.mxu0 %v1643_v22 }
  0xa2   : > { %1503 = vmatpush3.bf16.msra.mxu1 %v1638_v26 }
  0xa3   : > { %1504 = vmatprep.subr.bf16.mxu1 %v1639_v27 }
  0xa4   : > { %1517 = vmatpush3.bf16.msra.mxu0 %v1643_v22 }
  0xa6   : > { %1505 = vmatpush3.bf16.msra.mxu1 %v1639_v27 }
 0x137   : > { %v1397_v29 = vpop.f32.mrf.mxu0 }
 0x139   : > { %v1398_v30 = vpop.f32.mrf.mxu0  ;;  %v1425_v31 = vpop.f32.mrf.mxu1 }
 0x13a   : > { %v1399_v46 = vadd.f32 %v1398_v30, %v1397_v29 }
 0x13b   : > { %v1400_v32 = vpop.f32.mrf.mxu0  ;;  %v1426_v33 = vpop.f32.mrf.mxu1 }
 0x13c   : > { %v808_v50 = vadd.f32 %v1399_v46, %v1305_v48  ;;  %v1427_v51 = vadd.f32 %v1426_v33, %v1425_v31 }
 0x13d   : > { %v1401_v34 = vpop.f32.mrf.mxu0  ;;  %v1428_v35 = vpop.f32.mrf.mxu1 }
 0x13e   : > { %v1402_v52 = vadd.f32 %v1401_v34, %v1400_v32  ;;  %v856_v54 = vadd.f32 %v1427_v51, %v808_v50 }
 0x13f   : > { %v1403_v36 = vpop.f32.mrf.mxu0  ;;  %v1429_v37 = vpop.f32.mrf.mxu1 }
 0x140   : > { %v811_v56 = vadd.f32 %v1402_v52, %v1305_v48  ;;  %v1430_v57 = vadd.f32 %v1429_v37, %v1428_v35 }
 0x141   : > { %v1404_v38 = vpop.f32.mrf.mxu0  ;;  %v1431_v40 = vpop.f32.mrf.mxu1 }
 0x142   : > { %v1405_v58 = vadd.f32 %v1404_v38, %v1403_v36  ;;  %v859_v63 = vadd.f32 %v1430_v57, %v811_v56  ;;  %v1366_v36 = vld [vmem:[%s2083_s6] ss:$0 sm:$0xff] }
 0x143   : > { %v1406_v39 = vpop.f32.mrf.mxu0  ;;  %v1432_v42 = vpop.f32.mrf.mxu1 }
 0x144   : > { %v816_v0 = vadd.f32 %v1405_v58, %v1305_v48  ;;  %v1433_v1 = vadd.f32 %v1432_v42, %v1431_v40 }
 0x145   : > { %v1407_v41 = vpop.f32.mrf.mxu0  ;;  %v1434_v43 = vpop.f32.mrf.mxu1 }
 0x146   : > { %v864_v8 = vadd.f32 %v1433_v1, %v816_v0 }
 0x147   : > { %v1435_v44 = vpop.f32.mrf.mxu1 }
 0x149   : > { %v1488_v45 = vpop.f32.mrf.mxu1 }
 0x14b   : > { %v951_v47 = vpop.f32.mrf.mxu1 }
 0x14d   : > { %v1489_v49 = vpop.f32.mrf.mxu1 }
 0x14f   : > { %v954_v6 = vpop.f32.mrf.mxu1 }
 0x157   : > { %v1453_v53 = vpop.f32.mrf.mxu0 }
 0x159   : > { %v1454_v55 = vpop.f32.mrf.mxu0 }
 0x15a   : > { %v1455_v59 = vadd.f32 %v1454_v55, %v1453_v53 }
 0x15b   : > { %v1456_v60 = vpop.f32.mrf.mxu0 }
 0x15c   : > { %v904_v61 = vadd.f32 %v1455_v59, %v856_v54 }
 0x15d   : > { %v1457_v62 = vpop.f32.mrf.mxu0 }
 0x15e   : > { %v1458_v2 = vadd.f32 %v1457_v62, %v1456_v60  ;;  %v952_v4 = vadd.f32 %v951_v47, %v904_v61 }
 0x15f   : > { %v1459_v3 = vpop.f32.mrf.mxu0 }
 0x160   : > { %v907_v5 = vadd.f32 %v1458_v2, %v859_v63  ;;  %v965_v12 = vmax.f32 %v952_v4, 0.0 }
 0x161   : > { %v1460_v7 = vpop.f32.mrf.mxu0 }
 0x162   : > { %v955_v9 = vadd.f32 %v954_v6, %v907_v5  ;;  %v1461_v10 = vadd.f32 %v1460_v7, %v1459_v3 }
 0x163   : > { %v1462_v11 = vpop.f32.mrf.mxu0 }
 0x164   : > { %v966_v13 = vmax.f32 %v955_v9, 0.0  ;;  %v912_v14 = vadd.f32 %v1461_v10, %v864_v8 }
 0x165   : > { %v1463_v15 = vpop.f32.mrf.mxu0 }
 0x166   : > { %v968_v16 = vpack.c.bf16 %v966_v13, %v965_v12  ;;  %v960_v17 = vadd.f32 %v1488_v45, %v912_v14 }
 0x168   : > { %v967_v18 = vmax.f32 %v960_v17, 0.0  ;;  %1506 = vmatprep.mubr.bf16.mxu1 %v968_v16 }
 0x16a   : > { %v969_v19 = vpack.c.bf16 %v967_v18, %v967_v18 }
 0x16c   : > { %1507 = vmatmul.mubr.bf16.vlgmr.msra.gmra.mxu1 %v969_v19 }
 0x22c   : > { %v1508_v23 = vpop.f32.mrf.mxu1 }
 0x22d   : > { %v1084_v26 = vadd.f32 %v1508_v23, %v1357_v24 }
 0x22e   : > { %v1075_v25 = vpop.f32.mrf.mxu1 }
 0x22f   : > { %v1076_v28 = vadd.f32 %v1357_v24, %v1075_v25  ;;  %v1091_v31 = vmax.f32 %v1084_v26, 0.0 }
 0x230   : > { %v1509_v27 = vpop.f32.mrf.mxu1 }
 0x231   : > { %v1089_v32 = vmax.f32 %v1076_v28, 0.0  ;;  %v1093_v35 = vpack.c.bf16 %v1091_v31, %v1091_v31 }
 0x232   : > { %v1078_v29 = vpop.f32.mrf.mxu1 }
 0x233   : > { %v1079_v30 = vadd.f32 %v1357_v24, %v1078_v29 }
 0x235   : > { %v1090_v33 = vmax.f32 %v1079_v30, 0.0 }
 0x237   : > { %v1092_v34 = vpack.c.bf16 %v1090_v33, %v1089_v32 }
 0x239   : > { %1518 = vmatprep.mubr.msk.bf16.mxu0 %vm1133_vm1, %v1092_v34 }
 0x23a   : > { %1519 = vmatmul.mubr.msk.bf16.vlgmr.msra.gmra.mxu0 %vm1133_vm1, %v1093_v35 }
 0x2fa   : > { %v1520_v37 = vpop.f32.mrf.mxu0 }
 0x2fb   : > { %v1183_v38 = vadd.f32 %v1520_v37, %v1366_v36 }
 0x2fc   : > { %v1174_v39 = vpop.f32.mrf.mxu0 }
 0x2fd   : > { %1190 = vst [vmem:[%s319_s18 + $0x10] sm:$0xff] %v1183_v38  ;;  %v1175_v40 = vadd.f32 %v1366_v36, %v1174_v39 }
 0x2fe   : > { %v1521_v41 = vpop.f32.mrf.mxu0 }
 0x2ff   : > { %1188 = vst [vmem:[%s319_s18] sm:$0xff] %v1175_v40  ;;  %1198 = sbr.rel (!%p2095_p4) target bundleno = 799 (0x31f), region = 60 }
 0x300   : > { %v1177_v42 = vpop.f32.mrf.mxu0 }
 0x301   : > { %v1178_v43 = vadd.f32 %v1366_v36, %v1177_v42 }
 0x303   : > { %1189 = vst [vmem:[%s319_s18 + $0x8] sm:$0xff] %v1178_v43 }
 0x304   : > { %s2105_s21 = smov (!%p1201_p13, %s1200_s21), 3 }
 0x305   : > { %s2020_s22 = sshll.u32 %s2105_s21, 7 }
 0x306   : > { %s1205_s8 = ssub.s32 384, %s2020_s22 }
 0x307   : > { %1206 = vsyncadd %s1192_s20, %s1205_s8  ;;  %p1374_p5 = scmp.ne.s32.totalorder %s2020_s22, 0  ;;  %s1380_s1 = smul.u32 384, %s1836_s28 }
 0x308   : > { %s1211_s13 = sshll.u32 %s319_s18, 4  ;;  %s1772_s12 = smov [#allocation7]   ;;  %s2032_s13 = int_to_ptr.vmem [resolvable:$true] %s1211_s13 }
 0x309   : > { %s2030_s19 = scalar_lea.hbm %s2084_s7, %s1380_s1  ;;  %s1696_s11 = scalar_lea.vmem %s2032_s13, %s2020_s22 }
 0x30a   : > { %p1697_p1 = scmp.ne.s32.totalorder %s2032_s13, %s1696_s11  ;;  %s1700_s15 = sshll.u32 %s1772_s12, 4  ;;  %s1701_s15 = int_to_ptr.vmem [resolvable:$false] %s1700_s15 }
 0x30b   : > { %s1702_s28 = scalar_lea.vmem %s1701_s15, 768  ;;  %p1703_p3 = scmp.lt.s32.totalorder %s2032_s13, %s1701_s15 }
 0x30c   : > { %p1698_p0 = pnand %p1697_p1, %p1374_p5  ;;  %p1704_p8 = scmp.lt.s32.totalorder %s1702_s28, %s1696_s11 }
 0x30e   : > { %p1699_p7 = pneg %p1698_p0  ;;  %p1705_p9 = por %p1704_p8, %p1703_p3 }
 0x310   : > { %p1706_p6 = pnand %p1705_p9, %p1699_p7 }
 0x312   : > { %1709 = shalt.err (!%p1706_p6)
}
 0x313   : > { %s1710_s16 = scalar_lea.hbm %s2030_s19, %s2020_s22  ;;  %s1714_s21 = scalar_lea.hbm %s2084_s7, 640 }
 0x314   : > { %p1711_p11 = scmp.ne.s32.totalorder %s2030_s19, %s1710_s16  ;;  %p1715_p10 = scmp.lt.s32.totalorder %s2030_s19, %s2084_s7 }
 0x315   : > { %p1716_p4 = scmp.lt.s32.totalorder %s1714_s21, %s1710_s16 }
 0x316   : > { %p1712_p12 = pnand %p1711_p11, %p1374_p5 }
 0x317   : > { %p1717_p13 = por %p1716_p4, %p1715_p10 }
 0x318   : > { %p1713_p2 = pneg %p1712_p12 }
 0x31a   : > { %p1718_p1 = pnand %p1717_p13, %p1713_p2 }
 0x31c   : > { %1721 = shalt.err (!%p1718_p1)
}
 0x31d   : > { %s1773_s23 = smov 128   ;;  %s1774_s17 = smov 8  }
 0x31e   : > { %1217 = dma.vmem_to_hbm [thread:$0]  (%p1374_p5), %s2032_s13, %s2020_s22, %s2030_s19, %s1192_s20, %s1773_s23, %s1773_s23, %s1774_s17  }
 0x31f PF: > { %s1226_s11 = sand.u32 1, %s1752_s24   ;;  %p2096_p0 = scmp.ne.s32.totalorder %s2091_s14, 0 }
 0x320   : > { %p2097_p7 = scmp.ge.s32.totalorder %s1764_s27, 2  ;;  %s1227_s12 = scalar_lea.sflag [#allocation4], %s1226_s11 }
 0x322   : > { %p1537_p3 = pnand %p2097_p7, %p2096_p0 }
 0x324   : > { %p1538_p8 = pneg %p1537_p3 }
 0x326   : > { %1747 = dma.done.wait (%p1538_p8), %s1227_s12, 384  }
 0x327   : > { %1749 = vsyncadd (%p1538_p8), %s1227_s12, 4294966912  ;;  %p21_p9 = scmp.ge.s32.totalorder %s1840_s30, 4   ;;  %s2098_s24 = smov %s1756_s25 }
 0x328   : > { %s2099_s25 = smov %s1760_s26  ;;  %s2100_s26 = smov %s1852_s10 }
 0x329   : > { %s2101_s27 = smov %s1840_s30  ;;  %23 = sbr.rel (!%p21_p9) target bundleno = 8 (0x8), region = 97 }
 0x32e   :  { %1232 = vsyncpa [#allocation3], 1 }
 0x32f   :  { %1234 = vsyncpa [#allocation3 + $0x1], 1 }
 0x330   :  { %1235 = vsyncpa [#allocation6], 1 }
 0x331   :  { %1236 = vsyncpa [#allocation4], 1 }
 0x332   :  { %1238 = vsyncpa [#allocation4 + $0x1], 1 }

</bundles_post_ra>
